<compile_context>
chip_gen: v7x
topology: tpu7x:2x2x1
jax: 0.10.0
libtpu: 0.0.40
codegen_flags: <defaults>
</compile_context>

<pallas_src>
import jax
import jax.numpy as jnp
from jax import lax
from jax.experimental import pallas as pl
from jax.experimental.pallas import tpu as pltpu


# ----------------------------------------------------------------------------
# use_conv=True : 3x3 (odd k) convolution, stride 2, padding k//2
# ----------------------------------------------------------------------------
def _downsample_conv_kernel(x_ref, w_ref, b_ref, o_ref):
    # x_ref: (4, Hs, Ws, C)   four stride-2 phases of the padded image (1 batch)
    # w_ref: (k, k, C, Cout)  HWIO weights
    # b_ref: (1, Cout)        bias
    # o_ref: (1, Ho, Wo, Cout)
    _, ho, wo, cout = o_ref.shape
    k = w_ref.shape[0]
    c = w_ref.shape[2]

    acc = jnp.zeros((ho * wo, cout), dtype=jnp.float32)
    for kh in range(k):                      # static unroll over the k*k taps
        for kw in range(k):
            phase = (kh % 2) * 2 + (kw % 2)
            # contiguous window of the phase sub-image -> padded rows 2*ho+kh,
            # padded cols 2*wo+kw, exactly the stride-2 conv receptive field.
            patch = x_ref[phase,
                          kh // 2:kh // 2 + ho,
                          kw // 2:kw // 2 + wo, :]          # (Ho, Wo, C)
            acc = acc + jnp.dot(patch.reshape(ho * wo, c),
                                w_ref[kh, kw],
                                preferred_element_type=jnp.float32)

    out = acc + b_ref[...]                                  # (Ho*Wo, Cout)
    o_ref[...] = out.reshape(1, ho, wo, cout).astype(o_ref.dtype)


def downsample_conv2d(x, w_hwio, bias, *, kernel_size=3):
    """Downsample with conv: x (B, C, H, W) NCHW -> (B, Cout, Ho, Wo)."""
    B, C, H, W = x.shape
    k = int(kernel_size)
    assert k % 2 == 1, "odd kernel_size expected (padding = k // 2)"
    p = k // 2
    half = (k - 1) // 2
    Ho = (H + 2 * p - k) // 2 + 1
    Wo = (W + 2 * p - k) // 2 + 1
    Cout = w_hwio.shape[-1]

    # Phase sub-image extents (extra zero rows/cols are never read).
    Hs, Ws = Ho + half, Wo + half
    Hp, Wp = 2 * Hs, 2 * Ws

    # --- layout plumbing (XLA): NCHW -> NHWC, zero pad, space-to-depth ---
    x_nhwc = jnp.transpose(x, (0, 2, 3, 1)).astype(jnp.float32)
    x_pad = jnp.pad(x_nhwc, ((0, 0), (p, Hp - H - p), (p, Wp - W - p), (0, 0)))
    # (B, Hp, Wp, C) -> (B, 2, 2, Hs, Ws, C): phase (r, s) == x_pad[:, r::2, s::2, :]
    xs = x_pad.reshape(B, Hs, 2, Ws, 2, C).transpose(0, 2, 4, 1, 3, 5)
    xs = xs.reshape(B * 4, Hs, Ws, C)

    b2d = bias.reshape(1, Cout).astype(jnp.float32)
    w_f32 = w_hwio.astype(jnp.float32)

    out_nhwc = pl.pallas_call(
        _downsample_conv_kernel,
        out_shape=jax.ShapeDtypeStruct((B, Ho, Wo, Cout), jnp.float32),
        grid=(B,),
        in_specs=[
            pl.BlockSpec((4, Hs, Ws, C), lambda i: (i, 0, 0, 0)),
            pl.BlockSpec((k, k, C, Cout), lambda i: (0, 0, 0, 0)),
            pl.BlockSpec((1, Cout), lambda i: (0, 0)),
        ],
        out_specs=pl.BlockSpec((1, Ho, Wo, Cout), lambda i: (i, 0, 0, 0)),
        compiler_params=pltpu.CompilerParams(
            dimension_semantics=("parallel",)),
    )(xs, w_f32, b2d)

    return jnp.transpose(out_nhwc, (0, 3, 1, 2))            # back to NCHW


# ----------------------------------------------------------------------------
# use_conv=False : 2x2 average pool, stride 2
# ----------------------------------------------------------------------------
def _downsample_avgpool_kernel(x_ref, o_ref):
    # x_ref: (4, H2, W2, C)  four 2x2 phases of one batch element
    # o_ref: (1, H2, W2, C)
    s = x_ref[0] + x_ref[1] + x_ref[2] + x_ref[3]
    o_ref[0] = (s * 0.25).astype(o_ref.dtype)                # fold 1/4 as a mul


def downsample_avgpool2d(x):
    """Downsample without conv: x (B, C, H, W) -> (B, C, H//2, W//2)."""
    B, C, H, W = x.shape
    H2, W2 = H // 2, W // 2
    # crop to even extents (matches PyTorch floor behaviour), NCHW -> NHWC
    x_nhwc = jnp.transpose(x[:, :, :2 * H2, :2 * W2], (0, 2, 3, 1))
    x_nhwc = x_nhwc.astype(jnp.float32)
    xs = x_nhwc.reshape(B, H2, 2, W2, 2, C).transpose(0, 2, 4, 1, 3, 5)
    xs = xs.reshape(B * 4, H2, W2, C)

    out_nhwc = pl.pallas_call(
        _downsample_avgpool_kernel,
        out_shape=jax.ShapeDtypeStruct((B, H2, W2, C), jnp.float32),
        grid=(B,),
        in_specs=[pl.BlockSpec((4, H2, W2, C), lambda i: (i, 0, 0, 0))],
        out_specs=pl.BlockSpec((1, H2, W2, C), lambda i: (i, 0, 0, 0)),
        compiler_params=pltpu.CompilerParams(
            dimension_semantics=("parallel",)),
    )(xs)

    return jnp.transpose(out_nhwc, (0, 3, 1, 2))


def downsample(x, *, use_conv, w_hwio=None, bias=None, kernel_size=3):
    """Forward pass of Downsample (dims=2)."""
    if use_conv:
        return downsample_conv2d(x, w_hwio, bias, kernel_size=kernel_size)
    return downsample_avgpool2d(x)


# ----------------------------------------------------------------------------
if __name__ == "__main__":
    key = jax.random.PRNGKey(0)
    kx, kw, kb = jax.random.split(key, 3)

    B, C, H, W = 2, 8, 16, 16
    Cout, K = C, 3

    x = jax.random.normal(kx, (B, C, H, W), dtype=jnp.float32)
    w_oihw = jax.random.normal(kw, (Cout, C, K, K), dtype=jnp.float32) * 0.1
    bias = jax.random.normal(kb, (Cout,), dtype=jnp.float32) * 0.1
    w_hwio = jnp.transpose(w_oihw, (2, 3, 1, 0))

    # ---- use_conv=True path ----
    out_conv = jax.block_until_ready(
        downsample(x, use_conv=True, w_hwio=w_hwio, bias=bias, kernel_size=K))
    ref_conv = lax.conv_general_dilated(
        x, w_oihw, window_strides=(2, 2), padding=((1, 1), (1, 1)),
        dimension_numbers=("NCHW", "OIHW", "NCHW"),
        precision=lax.Precision.HIGHEST) + bias[None, :, None, None]
    assert out_conv.shape == (B, Cout, H // 2, W // 2), out_conv.shape
    assert jnp.allclose(out_conv, ref_conv, atol=3e-2, rtol=3e-2), \
        "conv downsample mismatch vs reference"

    # ---- use_conv=False path ----
    out_pool = jax.block_until_ready(downsample(x, use_conv=False))
    ref_pool = x.reshape(B, C, H // 2, 2, W // 2, 2).mean(axis=(3, 5))
    assert out_pool.shape == (B, C, H // 2, W // 2), out_pool.shape
    assert jnp.allclose(out_pool, ref_pool, atol=1e-5, rtol=1e-5), \
        "avg-pool downsample mismatch vs reference"

    print("KERNEL_OK")
</pallas_src>

<mosaic_0001>
module attributes {stable_mosaic.version = 11 : i64} {
  func.func @_downsample_conv_kernel(%arg0: i32, %arg1: memref<4x9x9x8xf32, #tpu.memory_space<vmem>>, %arg2: memref<3x3x8x8xf32, #tpu.memory_space<vmem>>, %arg3: memref<1x8xf32, #tpu.memory_space<vmem>>, %arg4: memref<1x8x8x8xf32, #tpu.memory_space<vmem>>) attributes {dimension_semantics = [#tpu.dimension_semantics<parallel>], iteration_bounds = array<i64: 2>, scalar_prefetch = 0 : i64, scratch_operands = 0 : i64, tpu.core_type = #tpu.core_type<tc>, window_params = [{transform_indices = @transform_0, window_bounds = array<i64: 4, 9, 9, 8>}, {pipeline_mode = #tpu.pipeline_mode<synchronous>, transform_indices = @transform_1, window_bounds = array<i64: 3, 3, 8, 8>}, {pipeline_mode = #tpu.pipeline_mode<synchronous>, transform_indices = @transform_2, window_bounds = array<i64: 1, 8>}, {transform_indices = @transform_3, window_bounds = array<i64: 1, 8, 8, 8>}]} {
    %cst = arith.constant 0.000000e+00 : f32
    %0 = vector.broadcast %cst : f32 to vector<64x8xf32>
    %c0 = arith.constant 0 : index
    %c0_0 = arith.constant 0 : index
    %c0_1 = arith.constant 0 : index
    %c0_2 = arith.constant 0 : index
    %1 = vector.load %arg1[%c0, %c0_0, %c0_1, %c0_2] : memref<4x9x9x8xf32, #tpu.memory_space<vmem>>, vector<1x8x8x8xf32>
    %2 = vector.shape_cast %1 : vector<1x8x8x8xf32> to vector<8x8x8xf32>
    %3 = vector.shape_cast %2 : vector<8x8x8xf32> to vector<64x8xf32>
    %c0_3 = arith.constant 0 : index
    %c0_4 = arith.constant 0 : index
    %c0_5 = arith.constant 0 : index
    %c0_6 = arith.constant 0 : index
    %4 = vector.load %arg2[%c0_3, %c0_4, %c0_5, %c0_6] : memref<3x3x8x8xf32, #tpu.memory_space<vmem>>, vector<1x1x8x8xf32>
    %5 = vector.shape_cast %4 : vector<1x1x8x8xf32> to vector<8x8xf32>
    %cst_7 = arith.constant dense<0.000000e+00> : vector<64x8xf32>
    %6 = tpu.matmul %3, %5, %cst_7 {dimension_numbers = #tpu.dot_dimension_numbers<[1], [0], [0], [1], [0, 0, 1, 1], [], []>} : vector<64x8xf32>, vector<8x8xf32>, vector<64x8xf32> -> vector<64x8xf32>
    %7 = arith.addf %0, %6 : vector<64x8xf32>
    %c1 = arith.constant 1 : index
    %c0_8 = arith.constant 0 : index
    %c0_9 = arith.constant 0 : index
    %c0_10 = arith.constant 0 : index
    %8 = vector.load %arg1[%c1, %c0_8, %c0_9, %c0_10] : memref<4x9x9x8xf32, #tpu.memory_space<vmem>>, vector<1x8x8x8xf32>
    %9 = vector.shape_cast %8 : vector<1x8x8x8xf32> to vector<8x8x8xf32>
    %10 = vector.shape_cast %9 : vector<8x8x8xf32> to vector<64x8xf32>
    %c0_11 = arith.constant 0 : index
    %c1_12 = arith.constant 1 : index
    %c0_13 = arith.constant 0 : index
    %c0_14 = arith.constant 0 : index
    %11 = vector.load %arg2[%c0_11, %c1_12, %c0_13, %c0_14] : memref<3x3x8x8xf32, #tpu.memory_space<vmem>>, vector<1x1x8x8xf32>
    %12 = vector.shape_cast %11 : vector<1x1x8x8xf32> to vector<8x8xf32>
    %cst_15 = arith.constant dense<0.000000e+00> : vector<64x8xf32>
    %13 = tpu.matmul %10, %12, %cst_15 {dimension_numbers = #tpu.dot_dimension_numbers<[1], [0], [0], [1], [0, 0, 1, 1], [], []>} : vector<64x8xf32>, vector<8x8xf32>, vector<64x8xf32> -> vector<64x8xf32>
    %14 = arith.addf %7, %13 : vector<64x8xf32>
    %c0_16 = arith.constant 0 : index
    %c0_17 = arith.constant 0 : index
    %c1_18 = arith.constant 1 : index
    %c0_19 = arith.constant 0 : index
    %15 = vector.load %arg1[%c0_16, %c0_17, %c1_18, %c0_19] : memref<4x9x9x8xf32, #tpu.memory_space<vmem>>, vector<1x8x8x8xf32>
    %16 = vector.shape_cast %15 : vector<1x8x8x8xf32> to vector<8x8x8xf32>
    %17 = vector.shape_cast %16 : vector<8x8x8xf32> to vector<64x8xf32>
    %c0_20 = arith.constant 0 : index
    %c2 = arith.constant 2 : index
    %c0_21 = arith.constant 0 : index
    %c0_22 = arith.constant 0 : index
    %18 = vector.load %arg2[%c0_20, %c2, %c0_21, %c0_22] : memref<3x3x8x8xf32, #tpu.memory_space<vmem>>, vector<1x1x8x8xf32>
    %19 = vector.shape_cast %18 : vector<1x1x8x8xf32> to vector<8x8xf32>
    %cst_23 = arith.constant dense<0.000000e+00> : vector<64x8xf32>
    %20 = tpu.matmul %17, %19, %cst_23 {dimension_numbers = #tpu.dot_dimension_numbers<[1], [0], [0], [1], [0, 0, 1, 1], [], []>} : vector<64x8xf32>, vector<8x8xf32>, vector<64x8xf32> -> vector<64x8xf32>
    %21 = arith.addf %14, %20 : vector<64x8xf32>
    %c2_24 = arith.constant 2 : index
    %c0_25 = arith.constant 0 : index
    %c0_26 = arith.constant 0 : index
    %c0_27 = arith.constant 0 : index
    %22 = vector.load %arg1[%c2_24, %c0_25, %c0_26, %c0_27] : memref<4x9x9x8xf32, #tpu.memory_space<vmem>>, vector<1x8x8x8xf32>
    %23 = vector.shape_cast %22 : vector<1x8x8x8xf32> to vector<8x8x8xf32>
    %24 = vector.shape_cast %23 : vector<8x8x8xf32> to vector<64x8xf32>
    %c1_28 = arith.constant 1 : index
    %c0_29 = arith.constant 0 : index
    %c0_30 = arith.constant 0 : index
    %c0_31 = arith.constant 0 : index
    %25 = vector.load %arg2[%c1_28, %c0_29, %c0_30, %c0_31] : memref<3x3x8x8xf32, #tpu.memory_space<vmem>>, vector<1x1x8x8xf32>
    %26 = vector.shape_cast %25 : vector<1x1x8x8xf32> to vector<8x8xf32>
    %cst_32 = arith.constant dense<0.000000e+00> : vector<64x8xf32>
    %27 = tpu.matmul %24, %26, %cst_32 {dimension_numbers = #tpu.dot_dimension_numbers<[1], [0], [0], [1], [0, 0, 1, 1], [], []>} : vector<64x8xf32>, vector<8x8xf32>, vector<64x8xf32> -> vector<64x8xf32>
    %28 = arith.addf %21, %27 : vector<64x8xf32>
    %c3 = arith.constant 3 : index
    %c0_33 = arith.constant 0 : index
    %c0_34 = arith.constant 0 : index
    %c0_35 = arith.constant 0 : index
    %29 = vector.load %arg1[%c3, %c0_33, %c0_34, %c0_35] : memref<4x9x9x8xf32, #tpu.memory_space<vmem>>, vector<1x8x8x8xf32>
    %30 = vector.shape_cast %29 : vector<1x8x8x8xf32> to vector<8x8x8xf32>
    %31 = vector.shape_cast %30 : vector<8x8x8xf32> to vector<64x8xf32>
    %c1_36 = arith.constant 1 : index
    %c1_37 = arith.constant 1 : index
    %c0_38 = arith.constant 0 : index
    %c0_39 = arith.constant 0 : index
    %32 = vector.load %arg2[%c1_36, %c1_37, %c0_38, %c0_39] : memref<3x3x8x8xf32, #tpu.memory_space<vmem>>, vector<1x1x8x8xf32>
    %33 = vector.shape_cast %32 : vector<1x1x8x8xf32> to vector<8x8xf32>
    %cst_40 = arith.constant dense<0.000000e+00> : vector<64x8xf32>
    %34 = tpu.matmul %31, %33, %cst_40 {dimension_numbers = #tpu.dot_dimension_numbers<[1], [0], [0], [1], [0, 0, 1, 1], [], []>} : vector<64x8xf32>, vector<8x8xf32>, vector<64x8xf32> -> vector<64x8xf32>
    %35 = arith.addf %28, %34 : vector<64x8xf32>
    %c2_41 = arith.constant 2 : index
    %c0_42 = arith.constant 0 : index
    %c1_43 = arith.constant 1 : index
    %c0_44 = arith.constant 0 : index
    %36 = vector.load %arg1[%c2_41, %c0_42, %c1_43, %c0_44] : memref<4x9x9x8xf32, #tpu.memory_space<vmem>>, vector<1x8x8x8xf32>
    %37 = vector.shape_cast %36 : vector<1x8x8x8xf32> to vector<8x8x8xf32>
    %38 = vector.shape_cast %37 : vector<8x8x8xf32> to vector<64x8xf32>
    %c1_45 = arith.constant 1 : index
    %c2_46 = arith.constant 2 : index
    %c0_47 = arith.constant 0 : index
    %c0_48 = arith.constant 0 : index
    %39 = vector.load %arg2[%c1_45, %c2_46, %c0_47, %c0_48] : memref<3x3x8x8xf32, #tpu.memory_space<vmem>>, vector<1x1x8x8xf32>
    %40 = vector.shape_cast %39 : vector<1x1x8x8xf32> to vector<8x8xf32>
    %cst_49 = arith.constant dense<0.000000e+00> : vector<64x8xf32>
    %41 = tpu.matmul %38, %40, %cst_49 {dimension_numbers = #tpu.dot_dimension_numbers<[1], [0], [0], [1], [0, 0, 1, 1], [], []>} : vector<64x8xf32>, vector<8x8xf32>, vector<64x8xf32> -> vector<64x8xf32>
    %42 = arith.addf %35, %41 : vector<64x8xf32>
    %c0_50 = arith.constant 0 : index
    %c1_51 = arith.constant 1 : index
    %c0_52 = arith.constant 0 : index
    %c0_53 = arith.constant 0 : index
    %43 = vector.load %arg1[%c0_50, %c1_51, %c0_52, %c0_53] : memref<4x9x9x8xf32, #tpu.memory_space<vmem>>, vector<1x8x8x8xf32>
    %44 = vector.shape_cast %43 : vector<1x8x8x8xf32> to vector<8x8x8xf32>
    %45 = vector.shape_cast %44 : vector<8x8x8xf32> to vector<64x8xf32>
    %c2_54 = arith.constant 2 : index
    %c0_55 = arith.constant 0 : index
    %c0_56 = arith.constant 0 : index
    %c0_57 = arith.constant 0 : index
    %46 = vector.load %arg2[%c2_54, %c0_55, %c0_56, %c0_57] : memref<3x3x8x8xf32, #tpu.memory_space<vmem>>, vector<1x1x8x8xf32>
    %47 = vector.shape_cast %46 : vector<1x1x8x8xf32> to vector<8x8xf32>
    %cst_58 = arith.constant dense<0.000000e+00> : vector<64x8xf32>
    %48 = tpu.matmul %45, %47, %cst_58 {dimension_numbers = #tpu.dot_dimension_numbers<[1], [0], [0], [1], [0, 0, 1, 1], [], []>} : vector<64x8xf32>, vector<8x8xf32>, vector<64x8xf32> -> vector<64x8xf32>
    %49 = arith.addf %42, %48 : vector<64x8xf32>
    %c1_59 = arith.constant 1 : index
    %c1_60 = arith.constant 1 : index
    %c0_61 = arith.constant 0 : index
    %c0_62 = arith.constant 0 : index
    %50 = vector.load %arg1[%c1_59, %c1_60, %c0_61, %c0_62] : memref<4x9x9x8xf32, #tpu.memory_space<vmem>>, vector<1x8x8x8xf32>
    %51 = vector.shape_cast %50 : vector<1x8x8x8xf32> to vector<8x8x8xf32>
    %52 = vector.shape_cast %51 : vector<8x8x8xf32> to vector<64x8xf32>
    %c2_63 = arith.constant 2 : index
    %c1_64 = arith.constant 1 : index
    %c0_65 = arith.constant 0 : index
    %c0_66 = arith.constant 0 : index
    %53 = vector.load %arg2[%c2_63, %c1_64, %c0_65, %c0_66] : memref<3x3x8x8xf32, #tpu.memory_space<vmem>>, vector<1x1x8x8xf32>
    %54 = vector.shape_cast %53 : vector<1x1x8x8xf32> to vector<8x8xf32>
    %cst_67 = arith.constant dense<0.000000e+00> : vector<64x8xf32>
    %55 = tpu.matmul %52, %54, %cst_67 {dimension_numbers = #tpu.dot_dimension_numbers<[1], [0], [0], [1], [0, 0, 1, 1], [], []>} : vector<64x8xf32>, vector<8x8xf32>, vector<64x8xf32> -> vector<64x8xf32>
    %56 = arith.addf %49, %55 : vector<64x8xf32>
    %c0_68 = arith.constant 0 : index
    %c1_69 = arith.constant 1 : index
    %c1_70 = arith.constant 1 : index
    %c0_71 = arith.constant 0 : index
    %57 = vector.load %arg1[%c0_68, %c1_69, %c1_70, %c0_71] : memref<4x9x9x8xf32, #tpu.memory_space<vmem>>, vector<1x8x8x8xf32>
    %58 = vector.shape_cast %57 : vector<1x8x8x8xf32> to vector<8x8x8xf32>
    %59 = vector.shape_cast %58 : vector<8x8x8xf32> to vector<64x8xf32>
    %c2_72 = arith.constant 2 : index
    %c2_73 = arith.constant 2 : index
    %c0_74 = arith.constant 0 : index
    %c0_75 = arith.constant 0 : index
    %60 = vector.load %arg2[%c2_72, %c2_73, %c0_74, %c0_75] : memref<3x3x8x8xf32, #tpu.memory_space<vmem>>, vector<1x1x8x8xf32>
    %61 = vector.shape_cast %60 : vector<1x1x8x8xf32> to vector<8x8xf32>
    %cst_76 = arith.constant dense<0.000000e+00> : vector<64x8xf32>
    %62 = tpu.matmul %59, %61, %cst_76 {dimension_numbers = #tpu.dot_dimension_numbers<[1], [0], [0], [1], [0, 0, 1, 1], [], []>} : vector<64x8xf32>, vector<8x8xf32>, vector<64x8xf32> -> vector<64x8xf32>
    %63 = arith.addf %56, %62 : vector<64x8xf32>
    %c0_77 = arith.constant 0 : index
    %c0_78 = arith.constant 0 : index
    %64 = vector.load %arg3[%c0_77, %c0_78] : memref<1x8xf32, #tpu.memory_space<vmem>>, vector<1x8xf32>
    %65 = vector.broadcast %64 : vector<1x8xf32> to vector<64x8xf32>
    %66 = arith.addf %63, %65 : vector<64x8xf32>
    %67 = vector.shape_cast %66 : vector<64x8xf32> to vector<1x8x8x8xf32>
    %c0_79 = arith.constant 0 : index
    %c0_80 = arith.constant 0 : index
    %c0_81 = arith.constant 0 : index
    %c0_82 = arith.constant 0 : index
    %68 = vector.load %arg4[%c0_79, %c0_80, %c0_81, %c0_82] : memref<1x8x8x8xf32, #tpu.memory_space<vmem>>, vector<1x8x8x8xf32>
    tpu.vector_store %arg4[%c0_79, %c0_80, %c0_81, %c0_82], %67 {strides = array<i32>} : memref<1x8x8x8xf32, #tpu.memory_space<vmem>>, vector<1x8x8x8xf32>,
    return
  }
  func.func @transform_0(%arg0: i32) -> (i32, i32, i32, i32) {
    %c0_i32 = arith.constant 0 : i32
    %c0_i32_0 = arith.constant 0 : i32
    %c0_i32_1 = arith.constant 0 : i32
    %c0_i32_2 = arith.constant 0 : i32
    return %arg0, %c0_i32, %c0_i32_0, %c0_i32_1 : i32, i32, i32, i32
  }
  func.func @transform_1(%arg0: i32) -> (i32, i32, i32, i32) {
    %c0_i32 = arith.constant 0 : i32
    %c0_i32_0 = arith.constant 0 : i32
    %c0_i32_1 = arith.constant 0 : i32
    %c0_i32_2 = arith.constant 0 : i32
    %c0_i32_3 = arith.constant 0 : i32
    return %c0_i32, %c0_i32_0, %c0_i32_1, %c0_i32_2 : i32, i32, i32, i32
  }
  func.func @transform_2(%arg0: i32) -> (i32, i32) {
    %c0_i32 = arith.constant 0 : i32
    %c0_i32_0 = arith.constant 0 : i32
    %c0_i32_1 = arith.constant 0 : i32
    return %c0_i32, %c0_i32_0 : i32, i32
  }
  func.func @transform_3(%arg0: i32) -> (i32, i32, i32, i32) {
    %c0_i32 = arith.constant 0 : i32
    %c0_i32_0 = arith.constant 0 : i32
    %c0_i32_1 = arith.constant 0 : i32
    %c0_i32_2 = arith.constant 0 : i32
    return %arg0, %c0_i32, %c0_i32_0, %c0_i32_1 : i32, i32, i32, i32
  }
}

</mosaic_0001>

<bundles_post_ra>
// kernel: tpu_custom_call.1
= control target key start
LH: loop header
LB: loop body
LE: loop exit
PB: predicated region body
PF: predicated region fallthrough
CT: control target
= control target key end

     0   :  { %8 = vsyncpa [#allocation3], 0  ;;  %s2451_s0 = inlined_call_operand.vmem [shape: f32[8,9,9,8], index: 0, kind: input, shape index: {}]   ;;  %s2452_s1 = inlined_call_operand.vmem [shape: f32[3,3,8,8], index: 1, kind: input, shape index: {}]   ;;  %s2453_s2 = inlined_call_operand.vmem [shape: f32[1,8], index: 2, kind: input, shape index: {}]   ;;  %s2454_s3 = inlined_call_operand.hbm [shape: f32[2,8,8,8], index: 3, kind: output, shape index: {}]  }
   0x1   :  { %10 = vsyncpa [#allocation3 + $0x1], 0  ;;  %s2137_s12 = smov 0   ;;  %s2139_s13 = smov 0  }
   0x2   :  { %s2141_s14 = smov 0   ;;  %s2143_s15 = smov 0  }
   0x3 LB: > { %s2158_s16 = sadd.s32 4294967295, %s2112_s15   ;;  %s1585_s17 = sadd.s32 4294967294, %s2112_s15   ;;  %s2112_s15 = sphi %s2143_s15, %s2460_s15   ;;  %s2108_s14 = sphi %s2141_s14, %s2459_s14   ;;  %s2104_s13 = sphi %s2139_s13, %s2458_s13   ;;  %s2100_s12 = sphi %s2137_s12, %s2457_s12  }
   0x4   : > { %s2162_s18 = sadd.s32 1, %s2112_s15   ;;  %s91_s19 = sadd.s32 1, %s2108_s14 }
   0x5   : > { %s88_s20 = ssub.s32 %s2112_s15, %s2162_s18  ;;  %p101_p0 = scmp.ne.s32.totalorder %s2108_s14, %s2104_s13 }
   0x6   : > { %p89_p1 = scmp.eq.s32.totalorder %s88_s20, 0  ;;  %p102_p2 = scmp.eq.s32.totalorder %s2158_s16, 1 }
   0x7   : > { %p107_p3 = scmp.ne.s32.totalorder %s2104_s13, %s2100_s12  ;;  %p108_p4 = scmp.eq.s32.totalorder %s1585_s17, 1 }
   0x8   : > { %s2173_s21 = scalar_select %p89_p1, %s2108_s14, %s91_s19  }
   0x9   : > { %p2175_p5 = por %p102_p2, %p101_p0  ;;  %p2179_p6 = por %p108_p4, %p107_p3 }
   0xa   : > { %p1588_p7 = scmp.ge.s32.totalorder %s2112_s15, 1  ;;  %p142_p8 = scmp.lt.s32.totalorder %s2112_s15, 3 }
   0xc   : > { %p143_p9 = pnand %p1588_p7, %p142_p8 }
   0xd   : > { %v1600_v0 = vld [vmem:[%s2452_s1 + $0x8] sm:$0xff] (!%p143_p9)  ;;  %v2191_v1 = vld [vmem:[%s2452_s1 + $0x20] sm:$0xff] (!%p143_p9)  ;;  %s1590_s28 = sshll.u32 (!%p143_p9), %s2158_s16, 2  ;;  %vm194_vm0 = vcmask (!%p143_p9), 64512   ;;  %v1685_v10 = vld [vmem:[%s2452_s1 + $0x30] sm:$0xff] (!%p143_p9)  ;;  %s164_s29 = sand.u32 (!%p143_p9), 1, %s2104_s13  }
   0xe   : > { %146 = sbr.rel (%p143_p9) target bundleno = 328 (0x148), region = 32  ;;  %v182_v2 = vld [vmem:[%s2452_s1] sm:$0xff] (!%p143_p9)  ;;  %1816 = vmatprep.subr.mxu1 (!%p143_p9), %v1600_v0  ;;  %1872 = vmatprep.subr.mxu0 (!%p143_p9), %v2191_v1  ;;  %p168_p10 = scmp.lt.s32.totalorder (!%p143_p9), %s1590_s28, 7  ;;  %v1668_v3 = vld [vmem:[%s2452_s1 + $0x28] sm:$0xff] (!%p143_p9)  ;;  %v1617_v11 = vld [vmem:[%s2452_s1 + $0x10] sm:$0xff] (!%p143_p9) }
   0xf   : > { %1817 = vmatpush3.msra.mxu1 (!%p143_p9), %v1600_v0  ;;  %1873 = vmatpush3.msra.mxu0 (!%p143_p9), %v2191_v1  ;;  %v1702_v20 = vld [vmem:[%s2452_s1 + $0x38] sm:$0xff] (!%p143_p9)  ;;  %v1719_v35 = vld [vmem:[%s2452_s1 + $0x40] sm:$0xff] (!%p143_p9)  ;;  %s1589_s30 = sshll.u32 (!%p143_p9), %s164_s29, 6  ;;  %s1734_s7 = sshll.u32 (!%p143_p9), %s2158_s16, 10 }
  0x10   : > { %1830 = vmatprep.subr.mxu1 (!%p143_p9), %v182_v2  ;;  %1886 = vmatprep.subr.mxu0 (!%p143_p9), %v1668_v3  ;;  %v1634_v29 = vld [vmem:[%s2452_s1 + $0x18] sm:$0xff] (!%p143_p9)  ;;  %s2400_s11 = scalar_lea.hbm (!%p143_p9), %s2454_s3, %s1734_s7  ;;  %s2410_s16 = scalar_lea.sflag (!%p143_p9), [#allocation3], %s164_s29 }
  0x11   : > { %s2114_s19 = smov (!%p143_p9), [#allocation2]  }
  0x12   : > { %s2054_s20 = sshll.u32 (!%p143_p9), %s2114_s19, 4  ;;  %s2055_s20 = int_to_ptr.vmem [resolvable:$false] %s2054_s20 }
  0x13   : > { %s2056_s24 = scalar_lea.vmem (!%p143_p9), %s2055_s20, 2048 }
  0x15   : > { %s2462_s28 = smov (!%p168_p10, %s1590_s28), 7 }
  0x16   : > { %s2008_s6 = smul.u32 144, %s2462_s28 }
  0x18   : > { %s2205_s9 = scalar_lea.vmem %s2451_s0, %s2008_s6  ;;  %s2381_s6 = scalar_lea.vmem [#allocation2], %s1589_s30 }
  0x19   : > { %v1592_v4 = vld [vmem:[%s2205_s9 + $0x90] sm:$0xff]  ;;  %v2210_v6 = vld [vmem:[%s2205_s9 + $0xa0] sm:$0xff]  ;;  %s1523_s8 = sshll.u32 %s2381_s6, 4  ;;  %s2402_s8 = int_to_ptr.vmem [resolvable:$true] %s1523_s8 }
  0x1a   : > { %v1643_v5 = vld [vmem:[%s2205_s9 + $0x1b0] sm:$0xff]  ;;  %1818 = vmatprep.mubr.msk.f32.mxu1 %vm194_vm0, %v1592_v4  ;;  %v1644_v7 = vld [vmem:[%s2205_s9 + $0x1c0] sm:$0xff]  ;;  %s2050_s17 = scalar_lea.vmem %s2402_s8, 1024  ;;  %p2057_p0 = scmp.lt.s32.totalorder %s2402_s8, %s2055_s20 }
  0x1b   : > { %1874 = vmatprep.mubr.msk.f32.mxu0 %vm194_vm0, %v1643_v5  ;;  %v2216_v8 = vld [vmem:[%s2205_s9 + $0xb0] sm:$0xff]  ;;  %1819 = vmatmul.mubr.msk.f32.vlgmr.msra.gmra.mrb[0].mxu1 %vm194_vm0, %v2210_v6  ;;  %v2229_v12 = vld [vmem:[%s2205_s9 + $0xc0] sm:$0xff]  ;;  %p2051_p11 = scmp.ne.s32.totalorder %s2402_s8, %s2050_s17  ;;  %p2058_p1 = scmp.lt.s32.totalorder %s2056_s24, %s2050_s17 }
  0x1c   : > { %v1645_v9 = vld [vmem:[%s2205_s9 + $0x1d0] sm:$0xff]  ;;  %1875 = vmatmul.mubr.msk.f32.vlgmr.msra.gmra.mrb[0].mxu0 %vm194_vm0, %v1644_v7  ;;  %1831 = vmatpush3.msra.mxu1 %v182_v2  ;;  %v1646_v13 = vld [vmem:[%s2205_s9 + $0x1e0] sm:$0xff] }
  0x1d   : > { %1887 = vmatpush3.msra.mxu0 %v1668_v3  ;;  %1821 = vmatprep.mubr.msk.f32.mxu1 %vm194_vm0, %v2216_v8  ;;  %v2236_v14 = vld [vmem:[%s2205_s9 + $0xd0] sm:$0xff]  ;;  %v1660_v15 = vld [vmem:[%s2205_s9 + $0x121] sm:$0xff]  ;;  %p2052_p12 = pnand %p2051_p11, %p2175_p5  ;;  %p2059_p2 = por %p2058_p1, %p2057_p0 }
  0x1e   : > { %1877 = vmatprep.mubr.msk.f32.mxu0 %vm194_vm0, %v1645_v9  ;;  %1900 = vmatprep.subr.mxu0 %v1685_v10  ;;  %v2246_v16 = vld [vmem:[%s2205_s9 + $0xe0] sm:$0xff]  ;;  %v1661_v17 = vld [vmem:[%s2205_s9 + $0x131] sm:$0xff] }
  0x1f   : > { %1844 = vmatprep.subr.mxu1 %v1617_v11  ;;  %1822 = vmatmul.mubr.msk.f32.gmra.mrb[2].mxu1 %vm194_vm0, %v2229_v12  ;;  %v2250_v18 = vld [vmem:[%s2205_s9 + $0xf0] sm:$0xff]  ;;  %v1662_v19 = vld [vmem:[%s2205_s9 + $0x141] sm:$0xff]  ;;  %p2053_p13 = pneg %p2052_p12 }
  0x20   : > { %1878 = vmatmul.mubr.msk.f32.gmra.mrb[2].mxu0 %vm194_vm0, %v1646_v13  ;;  %1824 = vmatprep.mubr.msk.f32.mxu1 %vm194_vm0, %v2236_v14  ;;  %v2262_v21 = vld [vmem:[%s2205_s9 + $0x100] sm:$0xff]  ;;  %v1663_v22 = vld [vmem:[%s2205_s9 + $0x151] sm:$0xff] }
  0x21   : > { %1888 = vmatprep.mubr.msk.f32.mxu0 %vm194_vm0, %v1660_v15  ;;  %v174_v23 = vld [vmem:[%s2205_s9] sm:$0xff]  ;;  %v175_v25 = vld [vmem:[%s2205_s9 + $0x10] sm:$0xff]  ;;  %p2060_p3 = pnand %p2059_p2, %p2053_p13 }
  0x22   : > { %v1664_v24 = vld [vmem:[%s2205_s9 + $0x161] sm:$0xff]  ;;  %v1665_v26 = vld [vmem:[%s2205_s9 + $0x171] sm:$0xff] }
  0x23   : > { %1825 = vmatmul.mubr.msk.f32.gmra.mrb[4].mxu1 %vm194_vm0, %v2246_v16  ;;  %v176_v27 = vld [vmem:[%s2205_s9 + $0x20] sm:$0xff]  ;;  %v177_v30 = vld [vmem:[%s2205_s9 + $0x30] sm:$0xff] }
  0x24   : > { %1889 = vmatmul.mubr.msk.f32.vlgmr.msra.gmra.mrb[0].mxu0 %vm194_vm0, %v1661_v17  ;;  %1827 = vmatprep.mubr.msk.f32.mxu1 %vm194_vm0, %v2250_v18  ;;  %v1666_v28 = vld [vmem:[%s2205_s9 + $0x181] sm:$0xff]  ;;  %v1667_v31 = vld [vmem:[%s2205_s9 + $0x191] sm:$0xff] }
  0x25   : > { %1901 = vmatpush3.msra.mxu0 %v1685_v10  ;;  %1891 = vmatprep.mubr.msk.f32.mxu0 %vm194_vm0, %v1662_v19  ;;  %v178_v32 = vld [vmem:[%s2205_s9 + $0x40] sm:$0xff]  ;;  %v179_v33 = vld [vmem:[%s2205_s9 + $0x50] sm:$0xff] }
  0x26   : > { %1914 = vmatprep.subr.mxu0 %v1702_v20  ;;  %v180_v34 = vld [vmem:[%s2205_s9 + $0x60] sm:$0xff]  ;;  %v181_v36 = vld [vmem:[%s2205_s9 + $0x70] sm:$0xff] }
  0x27   : > { %1828 = vmatmul.mubr.msk.f32.gmra.mrb[6].mxu1 %vm194_vm0, %v2262_v21  ;;  %v453_v37 = vld [vmem:[%s2205_s9 + $0x1] sm:$0xff]  ;;  %v454_v38 = vld [vmem:[%s2205_s9 + $0x11] sm:$0xff] }
  0x28   : > { %1892 = vmatmul.mubr.msk.f32.gmra.mrb[2].mxu0 %vm194_vm0, %v1663_v22  ;;  %1832 = vmatprep.mubr.msk.f32.mxu1 %vm194_vm0, %v174_v23  ;;  %v455_v39 = vld [vmem:[%s2205_s9 + $0x21] sm:$0xff]  ;;  %v456_v40 = vld [vmem:[%s2205_s9 + $0x31] sm:$0xff] }
  0x29   : > { %1894 = vmatprep.mubr.msk.f32.mxu0 %vm194_vm0, %v1664_v24  ;;  %v1684_v41 = vld [vmem:[%s2205_s9 + $0x80] sm:$0xff]  ;;  %v458_v43 = vld [vmem:[%s2205_s9 + $0x51] sm:$0xff] }
  0x2a   : > { %v457_v42 = vld [vmem:[%s2205_s9 + $0x41] sm:$0xff]  ;;  %v460_v45 = vld [vmem:[%s2205_s9 + $0x71] sm:$0xff] }
  0x2b   : > { %1833 = vmatmul.mubr.msk.f32.vlgmr.msra.gmra.mrb[0].mxu1 %vm194_vm0, %v175_v25  ;;  %v459_v44 = vld [vmem:[%s2205_s9 + $0x61] sm:$0xff]  ;;  %v1627_v47 = vld [vmem:[%s2205_s9 + $0x130] sm:$0xff] }
  0x2c   : > { %1895 = vmatmul.mubr.msk.f32.gmra.mrb[4].mxu0 %vm194_vm0, %v1665_v26  ;;  %1845 = vmatpush3.msra.mxu1 %v1617_v11  ;;  %v1626_v46 = vld [vmem:[%s2205_s9 + $0x120] sm:$0xff]  ;;  %v1629_v49 = vld [vmem:[%s2205_s9 + $0x150] sm:$0xff] }
  0x2d   : > { %1835 = vmatprep.mubr.msk.f32.mxu1 %vm194_vm0, %v176_v27  ;;  %1897 = vmatprep.mubr.msk.f32.mxu0 %vm194_vm0, %v1666_v28  ;;  %v1628_v48 = vld [vmem:[%s2205_s9 + $0x140] sm:$0xff]  ;;  %v1701_v50 = vld [vmem:[%s2205_s9 + $0x110] sm:$0xff] }
  0x2e   : > { %1858 = vmatprep.subr.mxu1 %v1634_v29  ;;  %v1630_v51 = vld [vmem:[%s2205_s9 + $0x160] sm:$0xff]  ;;  %v1631_v52 = vld [vmem:[%s2205_s9 + $0x170] sm:$0xff] }
  0x2f   : > { %1836 = vmatmul.mubr.msk.f32.gmra.mrb[2].mxu1 %vm194_vm0, %v177_v30  ;;  %v1632_v53 = vld [vmem:[%s2205_s9 + $0x180] sm:$0xff]  ;;  %v1633_v54 = vld [vmem:[%s2205_s9 + $0x190] sm:$0xff] }
  0x30   : > { %1898 = vmatmul.mubr.msk.f32.gmra.mrb[6].mxu0 %vm194_vm0, %v1667_v31  ;;  %1838 = vmatprep.mubr.msk.f32.mxu1 %vm194_vm0, %v178_v32  ;;  %v1647_v55 = vld [vmem:[%s2205_s9 + $0x1f0] sm:$0xff]  ;;  %v1648_v56 = vld [vmem:[%s2205_s9 + $0x200] sm:$0xff] }
  0x31   : > { %1902 = vmatprep.mubr.msk.f32.mxu0 %vm194_vm0, %v175_v25  ;;  %v1649_v57 = vld [vmem:[%s2205_s9 + $0x210] sm:$0xff]  ;;  %v1650_v58 = vld [vmem:[%s2205_s9 + $0x220] sm:$0xff] }
  0x32   : > { %v1718_v59 = vld [vmem:[%s2205_s9 + $0x81] sm:$0xff] }
  0x33   : > { %1839 = vmatmul.mubr.msk.f32.gmra.mrb[4].mxu1 %vm194_vm0, %v179_v33 }
  0x34   : > { %1903 = vmatmul.mubr.msk.f32.vlgmr.msra.gmra.mrb[0].mxu0 %vm194_vm0, %v176_v27  ;;  %1841 = vmatprep.mubr.msk.f32.mxu1 %vm194_vm0, %v180_v34 }
  0x35   : > { %1915 = vmatpush3.msra.mxu0 %v1702_v20  ;;  %1905 = vmatprep.mubr.msk.f32.mxu0 %vm194_vm0, %v177_v30 }
  0x36   : > { %1928 = vmatprep.subr.mxu0 %v1719_v35 }
  0x37   : > { %1842 = vmatmul.mubr.msk.f32.gmra.mrb[6].mxu1 %vm194_vm0, %v181_v36 }
  0x38   : > { %1906 = vmatmul.mubr.msk.f32.gmra.mrb[2].mxu0 %vm194_vm0, %v178_v32  ;;  %1846 = vmatprep.mubr.msk.f32.mxu1 %vm194_vm0, %v453_v37 }
  0x39   : > { %1908 = vmatprep.mubr.msk.f32.mxu0 %vm194_vm0, %v179_v33 }
  0x3b   : > { %1847 = vmatmul.mubr.msk.f32.vlgmr.msra.gmra.mrb[0].mxu1 %vm194_vm0, %v454_v38 }
  0x3c   : > { %1909 = vmatmul.mubr.msk.f32.gmra.mrb[4].mxu0 %vm194_vm0, %v180_v34  ;;  %1859 = vmatpush3.msra.mxu1 %v1634_v29 }
  0x3d   : > { %1849 = vmatprep.mubr.msk.f32.mxu1 %vm194_vm0, %v455_v39  ;;  %1911 = vmatprep.mubr.msk.f32.mxu0 %vm194_vm0, %v181_v36 }
  0x3e   : > { %1942 = vmatprep.subr.mxu1 %v2191_v1 }
  0x3f   : > { %1850 = vmatmul.mubr.msk.f32.gmra.mrb[2].mxu1 %vm194_vm0, %v456_v40 }
  0x40   : > { %1912 = vmatmul.mubr.msk.f32.gmra.mrb[6].mxu0 %vm194_vm0, %v1684_v41  ;;  %1852 = vmatprep.mubr.msk.f32.mxu1 %vm194_vm0, %v457_v42 }
  0x41   : > { %1916 = vmatprep.mubr.msk.f32.mxu0 %vm194_vm0, %v2210_v6 }
  0x43   : > { %1853 = vmatmul.mubr.msk.f32.gmra.mrb[4].mxu1 %vm194_vm0, %v458_v43 }
  0x44   : > { %1917 = vmatmul.mubr.msk.f32.vlgmr.msra.gmra.mrb[0].mxu0 %vm194_vm0, %v2216_v8  ;;  %1855 = vmatprep.mubr.msk.f32.mxu1 %vm194_vm0, %v459_v44 }
  0x45   : > { %1929 = vmatpush3.msra.mxu0 %v1719_v35  ;;  %1919 = vmatprep.mubr.msk.f32.mxu0 %vm194_vm0, %v2229_v12 }
  0x47   : > { %1856 = vmatmul.mubr.msk.f32.gmra.mrb[6].mxu1 %vm194_vm0, %v460_v45 }
  0x48   : > { %1920 = vmatmul.mubr.msk.f32.gmra.mrb[2].mxu0 %vm194_vm0, %v2236_v14  ;;  %1860 = vmatprep.mubr.msk.f32.mxu1 %vm194_vm0, %v1626_v46 }
  0x49   : > { %1922 = vmatprep.mubr.msk.f32.mxu0 %vm194_vm0, %v2246_v16 }
  0x4b   : > { %1861 = vmatmul.mubr.msk.f32.vlgmr.msra.gmra.mrb[0].mxu1 %vm194_vm0, %v1627_v47 }
  0x4c   : > { %1923 = vmatmul.mubr.msk.f32.gmra.mrb[4].mxu0 %vm194_vm0, %v2250_v18  ;;  %1943 = vmatpush3.msra.mxu1 %v2191_v1  ;;  %v1728_v1 = vld [vmem:[%s2453_s2] ss:$0 sm:$0xff] }
  0x4d   : > { %1863 = vmatprep.mubr.msk.f32.mxu1 %vm194_vm0, %v1628_v48  ;;  %1925 = vmatprep.mubr.msk.f32.mxu0 %vm194_vm0, %v2262_v21 }
  0x4f   : > { %1864 = vmatmul.mubr.msk.f32.gmra.mrb[2].mxu1 %vm194_vm0, %v1629_v49 }
  0x50   : > { %1926 = vmatmul.mubr.msk.f32.gmra.mrb[6].mxu0 %vm194_vm0, %v1701_v50  ;;  %1866 = vmatprep.mubr.msk.f32.mxu1 %vm194_vm0, %v1630_v51 }
  0x51   : > { %1930 = vmatprep.mubr.msk.f32.mxu0 %vm194_vm0, %v454_v38 }
  0x53   : > { %1867 = vmatmul.mubr.msk.f32.gmra.mrb[4].mxu1 %vm194_vm0, %v1631_v52 }
  0x54   : > { %1931 = vmatmul.mubr.msk.f32.vlgmr.msra.gmra.mrb[0].mxu0 %vm194_vm0, %v455_v39  ;;  %1869 = vmatprep.mubr.msk.f32.mxu1 %vm194_vm0, %v1632_v53 }
  0x55   : > { %1933 = vmatprep.mubr.msk.f32.mxu0 %vm194_vm0, %v456_v40 }
  0x57   : > { %1870 = vmatmul.mubr.msk.f32.gmra.mrb[6].mxu1 %vm194_vm0, %v1633_v54 }
  0x58   : > { %1934 = vmatmul.mubr.msk.f32.gmra.mrb[2].mxu0 %vm194_vm0, %v457_v42  ;;  %1880 = vmatprep.mubr.msk.f32.mxu1 %vm194_vm0, %v1647_v55 }
  0x59   : > { %1936 = vmatprep.mubr.msk.f32.mxu0 %vm194_vm0, %v458_v43 }
  0x5b   : > { %1881 = vmatmul.mubr.msk.f32.vlgmr.msra.gmra.mrb[4].mxu1 %vm194_vm0, %v1648_v56 }
  0x5c   : > { %1937 = vmatmul.mubr.msk.f32.gmra.mrb[4].mxu0 %vm194_vm0, %v459_v44  ;;  %1883 = vmatprep.mubr.msk.f32.mxu1 %vm194_vm0, %v1649_v57 }
  0x5d   : > { %1939 = vmatprep.mubr.msk.f32.mxu0 %vm194_vm0, %v460_v45 }
  0x5f   : > { %1884 = vmatmul.mubr.msk.f32.gmra.mrb[6].mxu1 %vm194_vm0, %v1650_v58 }
  0x60   : > { %1940 = vmatmul.mubr.msk.f32.gmra.mrb[6].mxu0 %vm194_vm0, %v1718_v59 }
 0x11e   : > { %v1862_v60 = vpop.f32.mrb[0].mxu1 }
 0x11f   : > { %v701_v61 = vpop.f32.mrb[1].mxu1 }
 0x122   : > { %v1865_v62 = vpop.f32.mrb[2].mxu1 }
 0x123   : > { %v711_v63 = vpop.f32.mrb[3].mxu1 }
 0x127   : > { %v1932_v0 = vpop.f32.mrb[0].mxu0 }
 0x128   : > { %v1944_v2 = vadd.f32 %v1932_v0, %v1862_v60  ;;  %v1439_v3 = vpop.f32.mrb[1].mxu0 }
 0x129   : > { %v1945_v4 = vadd.f32 %v1439_v3, %v701_v61 }
 0x12a   : > { %v1494_v5 = vadd.f32 %v1944_v2, %v1728_v1 }
 0x12b   : > { %v1493_v6 = vadd.f32 %v1945_v4, %v1728_v1  ;;  %v1935_v7 = vpop.f32.mrb[2].mxu0 }
 0x12c   : > { %1502 = vst.msk [vmem:[%s2381_s6 + $0x8] sm:$0xff] %vm194_vm0, %v1494_v5  ;;  %v1946_v8 = vadd.f32 %v1935_v7, %v1865_v62  ;;  %v1449_v9 = vpop.f32.mrb[3].mxu0 }
 0x12d   : > { %1501 = vst.msk [vmem:[%s2381_s6] sm:$0xff] %vm194_vm0, %v1493_v6  ;;  %v1947_v10 = vadd.f32 %v1449_v9, %v711_v63 }
 0x12e   : > { %v1496_v11 = vadd.f32 %v1946_v8, %v1728_v1  ;;  %v1882_v13 = vpop.f32.mrb[4].mxu1 }
 0x12f   : > { %v1495_v12 = vadd.f32 %v1947_v10, %v1728_v1  ;;  %v1938_v14 = vpop.f32.mrb[4].mxu0  ;;  %v869_v16 = vpop.f32.mrb[5].mxu1 }
 0x130   : > { %1504 = vst.msk [vmem:[%s2381_s6 + $0x18] sm:$0xff] %vm194_vm0, %v1496_v11  ;;  %v1948_v15 = vadd.f32 %v1938_v14, %v1882_v13  ;;  %v1459_v17 = vpop.f32.mrb[5].mxu0 }
 0x131   : > { %1503 = vst.msk [vmem:[%s2381_s6 + $0x10] sm:$0xff] %vm194_vm0, %v1495_v12  ;;  %v1949_v18 = vadd.f32 %v1459_v17, %v869_v16 }
 0x132   : > { %v1498_v19 = vadd.f32 %v1948_v15, %v1728_v1  ;;  %v1885_v21 = vpop.f32.mrb[6].mxu1 }
 0x133   : > { %v1497_v20 = vadd.f32 %v1949_v18, %v1728_v1  ;;  %v1941_v22 = vpop.f32.mrb[6].mxu0  ;;  %v879_v24 = vpop.f32.mrb[7].mxu1 }
 0x134   : > { %1506 = vst.msk [vmem:[%s2381_s6 + $0x28] sm:$0xff] %vm194_vm0, %v1498_v19  ;;  %v1950_v23 = vadd.f32 %v1941_v22, %v1885_v21  ;;  %v1469_v25 = vpop.f32.mrb[7].mxu0 }
 0x135   : > { %1505 = vst.msk [vmem:[%s2381_s6 + $0x20] sm:$0xff] %vm194_vm0, %v1497_v20  ;;  %v1951_v26 = vadd.f32 %v1469_v25, %v879_v24 }
 0x136   : > { %v1500_v27 = vadd.f32 %v1950_v23, %v1728_v1 }
 0x137   : > { %v1499_v28 = vadd.f32 %v1951_v26, %v1728_v1 }
 0x138   : > { %1508 = vst.msk [vmem:[%s2381_s6 + $0x38] sm:$0xff] %vm194_vm0, %v1500_v27 }
 0x139   : > { %1507 = vst.msk [vmem:[%s2381_s6 + $0x30] sm:$0xff] %vm194_vm0, %v1499_v28 }
 0x13a   : > { %2063 = shalt.err (!%p2060_p3)
}
 0x13b   : > { %s2064_s25 = scalar_lea.hbm %s2400_s11, 1024  ;;  %s2068_s28 = scalar_lea.hbm %s2454_s3, 2048 }
 0x13c   : > { %p2065_p4 = scmp.ne.s32.totalorder %s2400_s11, %s2064_s25  ;;  %p2069_p9 = scmp.lt.u32.totalorder %s2400_s11, %s2454_s3 }
 0x13d   : > { %p2070_p10 = scmp.lt.u32.totalorder %s2068_s28, %s2064_s25  ;;  %p2072_p12 = scmp.lt.u32.totalorder %s2064_s25, %s2400_s11 }
 0x13e   : > { %p2066_p7 = pnand %p2065_p4, %p2175_p5 }
 0x13f   : > { %p2071_p11 = por %p2070_p10, %p2069_p9 }
 0x140   : > { %p2067_p8 = pneg %p2066_p7 }
 0x141   : > { %p2073_p13 = por %p2072_p12, %p2071_p11 }
 0x143   : > { %p2074_p0 = pnand %p2073_p13, %p2067_p8 }
 0x145   : > { %2077 = shalt.err (!%p2074_p0)
}
 0x146   : > { %s2115_s4 = smov 128   ;;  %s2116_s5 = smov 8  }
 0x147   : > { %2009 = dma.vmem_to_hbm [thread:$0]  (%p2175_p5), %s2402_s8, 1024, %s2400_s11, %s2410_s16, %s2115_s4, %s2115_s4, %s2116_s5  }
 0x148 PF: > { %p2015_p1 = scmp.ge.s32.totalorder %s2112_s15, 2  ;;  %s1538_s6 = sand.u32 1, %s2100_s12  }
 0x149   : > { %s1539_s7 = scalar_lea.sflag [#allocation3], %s1538_s6 }
 0x14a   : > { %p2012_p2 = pnand %p2015_p1, %p2179_p6 }
 0x14c   : > { %2095 = dma.done.wait (!%p2012_p2), %s1539_s7, 1024  }
 0x14d   : > { %2097 = vsyncadd (!%p2012_p2), %s1539_s7, 4294966272  ;;  %p13_p3 = scmp.ge.s32.totalorder %s2162_s18, 4   ;;  %s2457_s12 = smov %s2104_s13 }
 0x14e   : > { %s2458_s13 = smov %s2108_s14  ;;  %s2459_s14 = smov %s2173_s21 }
 0x14f   : > { %s2460_s15 = smov %s2162_s18  ;;  %15 = sbr.rel (!%p13_p3) target bundleno = 3 (0x3), region = 80 }
 0x156   :  { %1544 = vsyncpa [#allocation3], 1 }
 0x157   :  { %1546 = vsyncpa [#allocation3 + $0x1], 1 }

</bundles_post_ra>
